<compile_context>
chip_gen: v6e
topology: v6e:2x2x1
jax: 0.10.0
libtpu: 0.0.40
codegen_flags: <defaults>
</compile_context>

<pallas_src>
import jax
import jax.numpy as jnp
from jax import lax
from jax.experimental import pallas as pl
from jax.experimental.pallas import tpu as pltpu

INPUT_SIZE = 784
NUM_CLASSES = 2   # == n_qubits
N_QUBITS = 2
N_LAYERS = 4


def _round_up(n, m):
    return ((n + m - 1) // m) * m


# ----------------------------------------------------------------------------
# Offline folding of the data-independent part of the circuit.
# ----------------------------------------------------------------------------
def circuit_coefficients(qweights):
    """Fold BasicEntanglerLayers(qweights) + PauliZ measurements into two real
    symmetric quadratic forms.

    Returns coefs (2, 10) f32 such that, with u = (c0c1, c0s1, s0c1, s0s1),
      <Z_k> = sum_m coefs[k, m] * prods_m(u)
    where prods = (u0^2, u1^2, u2^2, u3^2, u0u1, u0u2, u0u3, u1u2, u1u3, u2u3).
    """
    cplx = jnp.complex64
    qw = qweights.astype(jnp.float32)

    def rx(theta):
        c = jnp.cos(theta * 0.5).astype(cplx)
        s = jnp.sin(theta * 0.5).astype(cplx)
        return jnp.stack([jnp.stack([c, -1j * s]),
                          jnp.stack([-1j * s, c])])

    # basis index = 2*q0 + q1 (wire 0 is MSB), CNOT(control=0, target=1)
    cnot = jnp.array([[1, 0, 0, 0],
                      [0, 1, 0, 0],
                      [0, 0, 0, 1],
                      [0, 0, 1, 0]], dtype=cplx)

    u = jnp.eye(4, dtype=cplx)
    for l in range(qw.shape[0]):
        layer = cnot @ jnp.kron(rx(qw[l, 0]), rx(qw[l, 1]))
        u = layer @ u

    z0 = jnp.diag(jnp.array([1, 1, -1, -1], dtype=cplx))
    z1 = jnp.diag(jnp.array([1, -1, 1, -1], dtype=cplx))
    # Embedded state (RX(a0) (x) RX(a1)) |00> = D u with D = diag(1,-i,-i,-1)
    d = jnp.diag(jnp.array([1, -1j, -1j, -1], dtype=cplx))

    rows = []
    for z in (z0, z1):
        m = u.conj().T @ z @ u                # Hermitian 4x4
        a = jnp.real(d.conj().T @ m @ d)      # real symmetric 4x4
        rows.append(jnp.stack([
            a[0, 0], a[1, 1], a[2, 2], a[3, 3],
            2 * a[0, 1], 2 * a[0, 2], 2 * a[0, 3],
            2 * a[1, 2], 2 * a[1, 3], 2 * a[2, 3]]))
    return jnp.stack(rows).astype(jnp.float32)   # (2, 10)


# ----------------------------------------------------------------------------
# Pallas kernel
# ----------------------------------------------------------------------------
def hybrid_kernel(x_ref, w_ref, b_ref, coef_ref, out_ref):
    # Linear layer in transposed (lane-dense) form:
    #   angles^T = W @ x^T -> (2, TILE_B), batch on lanes.
    # Contracting the minor dims of both operands is the same native MXU
    # pattern as q @ k^T in flash attention, so no materialized transpose of
    # the big x tile is expected (verified-clean lowering).
    ang_t = lax.dot_general(
        w_ref[...], x_ref[...],
        dimension_numbers=(((1,), (1,)), ((), ())),
        preferred_element_type=jnp.float32,
    )
    a0 = ang_t[0:1, :] + b_ref[0]     # (1, TILE_B) f32
    a1 = ang_t[1:2, :] + b_ref[1]     # (1, TILE_B) f32

    # AngleEmbedding trig (the only data-dependent part of the circuit), EUP.
    c0 = jnp.cos(0.5 * a0)
    s0 = jnp.sin(0.5 * a0)
    c1 = jnp.cos(0.5 * a1)
    s1 = jnp.sin(0.5 * a1)

    u = (c0 * c1, c0 * s1, s0 * c1, s0 * s1)

    # <Z0>, <Z1> as precomputed quadratic forms; products are fused straight
    # into the two accumulators (few live (1, TILE_B) temporaries).
    pairs = ((0, 0), (1, 1), (2, 2), (3, 3),
             (0, 1), (0, 2), (0, 3), (1, 2), (1, 3), (2, 3))
    p = u[0] * u[0]
    z0 = p * coef_ref[0, 0]
    z1 = p * coef_ref[1, 0]
    for m in range(1, 10):
        i, j = pairs[m]
        p = u[i] * u[j]
        z0 = z0 + p * coef_ref[0, m]
        z1 = z1 + p * coef_ref[1, m]

    # Single lane-dense (2, TILE_B) store.
    out_ref[...] = jnp.concatenate([z0, z1], axis=0)


def _pick_tile_b(B, tile_b):
    """Batch-tile selection.

    * B <= 256: one full-array tile (block dims == array dims, no padding).
    * B  > 256: lane-dense multiple-of-128 tile, capped at the request, and
      shrunk if necessary so the grid has >= 2 steps (v7x megacore balance).
    """
    if B <= 256:
        return B
    tile = max(128, (min(tile_b, B) // 128) * 128)
    if B <= tile:  # would collapse to a 1-step grid -> split for 2 TCs
        tile = max(128, _round_up(pl.cdiv(B, 2), 128))
    return tile


def hybrid_forward(x, w, b, qweights, *, tile_b=2048):
    """x: (B, 784) f32 or bf16, w: (2, 784) f32 (torch nn.Linear layout),
    b: (2,) f32, qweights: (4, 2) f32.  Returns (B, 2) f32 = [<Z0>, <Z1>]."""
    B = x.shape[0]
    coefs = circuit_coefficients(qweights)           # (2, 10)
    w = w.astype(x.dtype)                             # bf16 x -> bf16 weights

    tile_b = _pick_tile_b(B, tile_b)
    grid = (pl.cdiv(B, tile_b),)                      # edge block handled by Pallas

    out_t = pl.pallas_call(
        hybrid_kernel,
        out_shape=jax.ShapeDtypeStruct((NUM_CLASSES, B), jnp.float32),
        grid=grid,
        in_specs=[
            pl.BlockSpec((tile_b, INPUT_SIZE), lambda i: (i, 0)),        # x tile
            pl.BlockSpec((NUM_CLASSES, INPUT_SIZE), lambda i: (0, 0)),   # W (resident)
            pl.BlockSpec(memory_space=pltpu.MemorySpace.SMEM),           # bias
            pl.BlockSpec(memory_space=pltpu.MemorySpace.SMEM),           # circuit coefs
        ],
        out_specs=pl.BlockSpec((NUM_CLASSES, tile_b), lambda i: (0, i)),
        compiler_params=pltpu.CompilerParams(
            dimension_semantics=("parallel",),
            vmem_limit_bytes=32 * 1024 * 1024),
    )(x, w, b.astype(jnp.float32), coefs)

    return out_t.T                                    # (B, 2)


# ----------------------------------------------------------------------------
# Pure-JAX analytic reference (independent statevector simulation)
# ----------------------------------------------------------------------------
def hybrid_reference(x, w, b, qweights):
    angles = jnp.dot(x, w.T, precision=jax.lax.Precision.HIGHEST) + b.reshape(1, 2)
    a0, a1 = angles[:, 0], angles[:, 1]
    B = x.shape[0]
    amp = jnp.zeros((B, 4), jnp.complex64).at[:, 0].set(1.0)

    def rx_on(amp, wire, theta):
        c = jnp.cos(0.5 * theta).astype(jnp.complex64)
        s = jnp.sin(0.5 * theta).astype(jnp.complex64)
        pairs = [(0, 2), (1, 3)] if wire == 0 else [(0, 1), (2, 3)]
        new = amp
        for ui, vi in pairs:
            u, v = amp[:, ui], amp[:, vi]
            new = new.at[:, ui].set(c * u - 1j * s * v)
            new = new.at[:, vi].set(-1j * s * u + c * v)
        return new

    amp = rx_on(amp, 0, a0)
    amp = rx_on(amp, 1, a1)
    for l in range(qweights.shape[0]):
        amp = rx_on(amp, 0, qweights[l, 0])
        amp = rx_on(amp, 1, qweights[l, 1])
        amp = amp[:, jnp.array([0, 1, 3, 2])]   # CNOT(0,1): swap |10> <-> |11>
    p = jnp.abs(amp) ** 2
    z0 = p[:, 0] + p[:, 1] - p[:, 2] - p[:, 3]
    z1 = p[:, 0] - p[:, 1] + p[:, 2] - p[:, 3]
    return jnp.stack([z0, z1], axis=-1)


if __name__ == "__main__":
    key = jax.random.PRNGKey(0)
    kx, kw, kb, kq, kx2 = jax.random.split(key, 5)

    bound = 1.0 / float(INPUT_SIZE) ** 0.5
    w = jax.random.uniform(kw, (NUM_CLASSES, INPUT_SIZE), jnp.float32,
                           minval=-bound, maxval=bound)
    b = jax.random.uniform(kb, (NUM_CLASSES,), jnp.float32,
                           minval=-bound, maxval=bound)
    qweights = jax.random.uniform(kq, (N_LAYERS, N_QUBITS), jnp.float32,
                                  minval=0.0, maxval=2.0 * jnp.pi)

    # 1) Small batch: single full-array tile fast path.
    batch = 2
    x = jax.random.normal(kx, (batch, INPUT_SIZE), jnp.float32)
    out = hybrid_forward(x, w, b, qweights)
    jax.block_until_ready(out)
    assert out.shape == (batch, NUM_CLASSES)
    ref = hybrid_reference(x, w, b, qweights)
    assert jnp.allclose(out, ref, atol=1e-2, rtol=1e-2), (out, ref)

    # 2) Multi-tile grid with a non-divisible batch: no wrapper pad, Pallas
    #    edge block, >= 2 grid steps (v7x megacore path).
    batch2 = 300
    x2 = jax.random.normal(kx2, (batch2, INPUT_SIZE), jnp.float32)
    ref2 = hybrid_reference(x2, w, b, qweights)

    out2 = hybrid_forward(x2, w, b, qweights)            # auto tile -> 256, grid=2
    jax.block_until_ready(out2)
    assert out2.shape == (batch2, NUM_CLASSES)
    assert jnp.allclose(out2, ref2, atol=1e-2, rtol=1e-2)

    out3 = hybrid_forward(x2, w, b, qweights, tile_b=128)  # explicit small tile, grid=3
    jax.block_until_ready(out3)
    assert jnp.allclose(out3, ref2, atol=1e-2, rtol=1e-2)

    # 3) bf16 activations (halved HBM read traffic); slightly looser tolerance
    #    for the bf16 input/weight quantization.
    out_bf16 = hybrid_forward(x2.astype(jnp.bfloat16), w, b, qweights)
    jax.block_until_ready(out_bf16)
    assert jnp.allclose(out_bf16, ref2, atol=3e-2, rtol=3e-2)

    print("KERNEL_OK")
</pallas_src>

<mosaic_0001>
module attributes {stable_mosaic.version = 11 : i64} {
  func.func @hybrid_kernel(%arg0: i32, %arg1: memref<2x784xf32, #tpu.memory_space<vmem>>, %arg2: memref<2x784xf32, #tpu.memory_space<vmem>>, %arg3: memref<2xf32, #tpu.memory_space<smem>>, %arg4: memref<2x10xf32, #tpu.memory_space<smem>>, %arg5: memref<2x2xf32, #tpu.memory_space<vmem>>) attributes {dimension_semantics = [#tpu.dimension_semantics<parallel>], iteration_bounds = array<i64: 1>, scalar_prefetch = 0 : i64, scratch_operands = 0 : i64, tpu.core_type = #tpu.core_type<tc>, window_params = [{transform_indices = @transform_0, window_bounds = array<i64: 2, 784>}, {pipeline_mode = #tpu.pipeline_mode<synchronous>, transform_indices = @transform_1, window_bounds = array<i64: 2, 784>}, {transform_indices = @transform_2, window_bounds = array<i64: 2>}, {transform_indices = @transform_3, window_bounds = array<i64: 2, 10>}, {transform_indices = @transform_4, window_bounds = array<i64: 2, 2>}]} {
    %c0 = arith.constant 0 : index
    %c0_0 = arith.constant 0 : index
    %0 = vector.load %arg2[%c0, %c0_0] : memref<2x784xf32, #tpu.memory_space<vmem>>, vector<2x784xf32>
    %c0_1 = arith.constant 0 : index
    %c0_2 = arith.constant 0 : index
    %1 = vector.load %arg1[%c0_1, %c0_2] : memref<2x784xf32, #tpu.memory_space<vmem>>, vector<2x784xf32>
    %cst = arith.constant dense<0.000000e+00> : vector<2x2xf32>
    %2 = tpu.matmul %0, %1, %cst {dimension_numbers = #tpu.dot_dimension_numbers<[1], [1], [0], [0], [0, 0, 1, 0], [], []>} : vector<2x784xf32>, vector<2x784xf32>, vector<2x2xf32> -> vector<2x2xf32>
    %3 = vector.extract_strided_slice %2 {offsets = [0, 0], sizes = [1, 2], strides = [1, 1]} : vector<2x2xf32> to vector<1x2xf32>
    %c0_3 = arith.constant 0 : index
    %4 = memref.load %arg3[%c0_3] : memref<2xf32, #tpu.memory_space<smem>>
    %5 = vector.broadcast %4 : f32 to vector<1x2xf32>
    %6 = arith.addf %3, %5 : vector<1x2xf32>
    %7 = vector.extract_strided_slice %2 {offsets = [1, 0], sizes = [1, 2], strides = [1, 1]} : vector<2x2xf32> to vector<1x2xf32>
    %c1 = arith.constant 1 : index
    %8 = memref.load %arg3[%c1] : memref<2xf32, #tpu.memory_space<smem>>
    %9 = vector.broadcast %8 : f32 to vector<1x2xf32>
    %10 = arith.addf %7, %9 : vector<1x2xf32>
    %cst_4 = arith.constant 5.000000e-01 : f32
    %11 = vector.broadcast %cst_4 : f32 to vector<1x2xf32>
    %12 = arith.mulf %11, %6 : vector<1x2xf32>
    %13 = math.cos %12 : vector<1x2xf32>
    %cst_5 = arith.constant 5.000000e-01 : f32
    %14 = vector.broadcast %cst_5 : f32 to vector<1x2xf32>
    %15 = arith.mulf %14, %6 : vector<1x2xf32>
    %16 = math.sin %15 : vector<1x2xf32>
    %cst_6 = arith.constant 5.000000e-01 : f32
    %17 = vector.broadcast %cst_6 : f32 to vector<1x2xf32>
    %18 = arith.mulf %17, %10 : vector<1x2xf32>
    %19 = math.cos %18 : vector<1x2xf32>
    %cst_7 = arith.constant 5.000000e-01 : f32
    %20 = vector.broadcast %cst_7 : f32 to vector<1x2xf32>
    %21 = arith.mulf %20, %10 : vector<1x2xf32>
    %22 = math.sin %21 : vector<1x2xf32>
    %23 = arith.mulf %13, %19 : vector<1x2xf32>
    %24 = arith.mulf %13, %22 : vector<1x2xf32>
    %25 = arith.mulf %16, %19 : vector<1x2xf32>
    %26 = arith.mulf %16, %22 : vector<1x2xf32>
    %27 = arith.mulf %23, %23 : vector<1x2xf32>
    %c0_8 = arith.constant 0 : index
    %c0_9 = arith.constant 0 : index
    %28 = memref.load %arg4[%c0_8, %c0_9] : memref<2x10xf32, #tpu.memory_space<smem>>
    %29 = vector.broadcast %28 : f32 to vector<1x2xf32>
    %30 = arith.mulf %27, %29 : vector<1x2xf32>
    %c1_10 = arith.constant 1 : index
    %c0_11 = arith.constant 0 : index
    %31 = memref.load %arg4[%c1_10, %c0_11] : memref<2x10xf32, #tpu.memory_space<smem>>
    %32 = vector.broadcast %31 : f32 to vector<1x2xf32>
    %33 = arith.mulf %27, %32 : vector<1x2xf32>
    %34 = arith.mulf %24, %24 : vector<1x2xf32>
    %c0_12 = arith.constant 0 : index
    %c1_13 = arith.constant 1 : index
    %35 = memref.load %arg4[%c0_12, %c1_13] : memref<2x10xf32, #tpu.memory_space<smem>>
    %36 = vector.broadcast %35 : f32 to vector<1x2xf32>
    %37 = arith.mulf %34, %36 : vector<1x2xf32>
    %38 = arith.addf %30, %37 : vector<1x2xf32>
    %c1_14 = arith.constant 1 : index
    %c1_15 = arith.constant 1 : index
    %39 = memref.load %arg4[%c1_14, %c1_15] : memref<2x10xf32, #tpu.memory_space<smem>>
    %40 = vector.broadcast %39 : f32 to vector<1x2xf32>
    %41 = arith.mulf %34, %40 : vector<1x2xf32>
    %42 = arith.addf %33, %41 : vector<1x2xf32>
    %43 = arith.mulf %25, %25 : vector<1x2xf32>
    %c0_16 = arith.constant 0 : index
    %c2 = arith.constant 2 : index
    %44 = memref.load %arg4[%c0_16, %c2] : memref<2x10xf32, #tpu.memory_space<smem>>
    %45 = vector.broadcast %44 : f32 to vector<1x2xf32>
    %46 = arith.mulf %43, %45 : vector<1x2xf32>
    %47 = arith.addf %38, %46 : vector<1x2xf32>
    %c1_17 = arith.constant 1 : index
    %c2_18 = arith.constant 2 : index
    %48 = memref.load %arg4[%c1_17, %c2_18] : memref<2x10xf32, #tpu.memory_space<smem>>
    %49 = vector.broadcast %48 : f32 to vector<1x2xf32>
    %50 = arith.mulf %43, %49 : vector<1x2xf32>
    %51 = arith.addf %42, %50 : vector<1x2xf32>
    %52 = arith.mulf %26, %26 : vector<1x2xf32>
    %c0_19 = arith.constant 0 : index
    %c3 = arith.constant 3 : index
    %53 = memref.load %arg4[%c0_19, %c3] : memref<2x10xf32, #tpu.memory_space<smem>>
    %54 = vector.broadcast %53 : f32 to vector<1x2xf32>
    %55 = arith.mulf %52, %54 : vector<1x2xf32>
    %56 = arith.addf %47, %55 : vector<1x2xf32>
    %c1_20 = arith.constant 1 : index
    %c3_21 = arith.constant 3 : index
    %57 = memref.load %arg4[%c1_20, %c3_21] : memref<2x10xf32, #tpu.memory_space<smem>>
    %58 = vector.broadcast %57 : f32 to vector<1x2xf32>
    %59 = arith.mulf %52, %58 : vector<1x2xf32>
    %60 = arith.addf %51, %59 : vector<1x2xf32>
    %61 = arith.mulf %23, %24 : vector<1x2xf32>
    %c0_22 = arith.constant 0 : index
    %c4 = arith.constant 4 : index
    %62 = memref.load %arg4[%c0_22, %c4] : memref<2x10xf32, #tpu.memory_space<smem>>
    %63 = vector.broadcast %62 : f32 to vector<1x2xf32>
    %64 = arith.mulf %61, %63 : vector<1x2xf32>
    %65 = arith.addf %56, %64 : vector<1x2xf32>
    %c1_23 = arith.constant 1 : index
    %c4_24 = arith.constant 4 : index
    %66 = memref.load %arg4[%c1_23, %c4_24] : memref<2x10xf32, #tpu.memory_space<smem>>
    %67 = vector.broadcast %66 : f32 to vector<1x2xf32>
    %68 = arith.mulf %61, %67 : vector<1x2xf32>
    %69 = arith.addf %60, %68 : vector<1x2xf32>
    %70 = arith.mulf %23, %25 : vector<1x2xf32>
    %c0_25 = arith.constant 0 : index
    %c5 = arith.constant 5 : index
    %71 = memref.load %arg4[%c0_25, %c5] : memref<2x10xf32, #tpu.memory_space<smem>>
    %72 = vector.broadcast %71 : f32 to vector<1x2xf32>
    %73 = arith.mulf %70, %72 : vector<1x2xf32>
    %74 = arith.addf %65, %73 : vector<1x2xf32>
    %c1_26 = arith.constant 1 : index
    %c5_27 = arith.constant 5 : index
    %75 = memref.load %arg4[%c1_26, %c5_27] : memref<2x10xf32, #tpu.memory_space<smem>>
    %76 = vector.broadcast %75 : f32 to vector<1x2xf32>
    %77 = arith.mulf %70, %76 : vector<1x2xf32>
    %78 = arith.addf %69, %77 : vector<1x2xf32>
    %79 = arith.mulf %23, %26 : vector<1x2xf32>
    %c0_28 = arith.constant 0 : index
    %c6 = arith.constant 6 : index
    %80 = memref.load %arg4[%c0_28, %c6] : memref<2x10xf32, #tpu.memory_space<smem>>
    %81 = vector.broadcast %80 : f32 to vector<1x2xf32>
    %82 = arith.mulf %79, %81 : vector<1x2xf32>
    %83 = arith.addf %74, %82 : vector<1x2xf32>
    %c1_29 = arith.constant 1 : index
    %c6_30 = arith.constant 6 : index
    %84 = memref.load %arg4[%c1_29, %c6_30] : memref<2x10xf32, #tpu.memory_space<smem>>
    %85 = vector.broadcast %84 : f32 to vector<1x2xf32>
    %86 = arith.mulf %79, %85 : vector<1x2xf32>
    %87 = arith.addf %78, %86 : vector<1x2xf32>
    %88 = arith.mulf %24, %25 : vector<1x2xf32>
    %c0_31 = arith.constant 0 : index
    %c7 = arith.constant 7 : index
    %89 = memref.load %arg4[%c0_31, %c7] : memref<2x10xf32, #tpu.memory_space<smem>>
    %90 = vector.broadcast %89 : f32 to vector<1x2xf32>
    %91 = arith.mulf %88, %90 : vector<1x2xf32>
    %92 = arith.addf %83, %91 : vector<1x2xf32>
    %c1_32 = arith.constant 1 : index
    %c7_33 = arith.constant 7 : index
    %93 = memref.load %arg4[%c1_32, %c7_33] : memref<2x10xf32, #tpu.memory_space<smem>>
    %94 = vector.broadcast %93 : f32 to vector<1x2xf32>
    %95 = arith.mulf %88, %94 : vector<1x2xf32>
    %96 = arith.addf %87, %95 : vector<1x2xf32>
    %97 = arith.mulf %24, %26 : vector<1x2xf32>
    %c0_34 = arith.constant 0 : index
    %c8 = arith.constant 8 : index
    %98 = memref.load %arg4[%c0_34, %c8] : memref<2x10xf32, #tpu.memory_space<smem>>
    %99 = vector.broadcast %98 : f32 to vector<1x2xf32>
    %100 = arith.mulf %97, %99 : vector<1x2xf32>
    %101 = arith.addf %92, %100 : vector<1x2xf32>
    %c1_35 = arith.constant 1 : index
    %c8_36 = arith.constant 8 : index
    %102 = memref.load %arg4[%c1_35, %c8_36] : memref<2x10xf32, #tpu.memory_space<smem>>
    %103 = vector.broadcast %102 : f32 to vector<1x2xf32>
    %104 = arith.mulf %97, %103 : vector<1x2xf32>
    %105 = arith.addf %96, %104 : vector<1x2xf32>
    %106 = arith.mulf %25, %26 : vector<1x2xf32>
    %c0_37 = arith.constant 0 : index
    %c9 = arith.constant 9 : index
    %107 = memref.load %arg4[%c0_37, %c9] : memref<2x10xf32, #tpu.memory_space<smem>>
    %108 = vector.broadcast %107 : f32 to vector<1x2xf32>
    %109 = arith.mulf %106, %108 : vector<1x2xf32>
    %110 = arith.addf %101, %109 : vector<1x2xf32>
    %c1_38 = arith.constant 1 : index
    %c9_39 = arith.constant 9 : index
    %111 = memref.load %arg4[%c1_38, %c9_39] : memref<2x10xf32, #tpu.memory_space<smem>>
    %112 = vector.broadcast %111 : f32 to vector<1x2xf32>
    %113 = arith.mulf %106, %112 : vector<1x2xf32>
    %114 = arith.addf %105, %113 : vector<1x2xf32>
    %115 = tpu.concatenate %110, %114 in 0 : vector<1x2xf32>, vector<1x2xf32> -> vector<2x2xf32>
    %c0_40 = arith.constant 0 : index
    %c0_41 = arith.constant 0 : index
    %116 = vector.load %arg5[%c0_40, %c0_41] : memref<2x2xf32, #tpu.memory_space<vmem>>, vector<2x2xf32>
    tpu.vector_store %arg5[%c0_40, %c0_41], %115 {strides = array<i32>} : memref<2x2xf32, #tpu.memory_space<vmem>>, vector<2x2xf32>,
    return
  }
  func.func @transform_0(%arg0: i32) -> (i32, i32) {
    %c0_i32 = arith.constant 0 : i32
    %c0_i32_0 = arith.constant 0 : i32
    return %arg0, %c0_i32 : i32, i32
  }
  func.func @transform_1(%arg0: i32) -> (i32, i32) {
    %c0_i32 = arith.constant 0 : i32
    %c0_i32_0 = arith.constant 0 : i32
    %c0_i32_1 = arith.constant 0 : i32
    return %c0_i32, %c0_i32_0 : i32, i32
  }
  func.func @transform_2(%arg0: i32) -> i32 {
    %c0_i32 = arith.constant 0 : i32
    %c0_i32_0 = arith.constant 0 : i32
    return %c0_i32 : i32
  }
  func.func @transform_3(%arg0: i32) -> (i32, i32) {
    %c0_i32 = arith.constant 0 : i32
    %c0_i32_0 = arith.constant 0 : i32
    %c0_i32_1 = arith.constant 0 : i32
    return %c0_i32, %c0_i32_0 : i32, i32
  }
  func.func @transform_4(%arg0: i32) -> (i32, i32) {
    %c0_i32 = arith.constant 0 : i32
    %c0_i32_0 = arith.constant 0 : i32
    return %c0_i32, %arg0 : i32, i32
  }
}

</mosaic_0001>

<bundles_post_ra>
// kernel: tpu_custom_call.1
= control target key start
LH: loop header
LB: loop body
LE: loop exit
PB: predicated region body
PF: predicated region fallthrough
CT: control target
= control target key end

     0   :  { %9 = vsyncpa [#allocation3], 0  ;;  %s1366_s0 = inlined_call_operand.hbm [shape: f32[2,784], index: 0, kind: input, shape index: {}]   ;;  %s1367_s1 = inlined_call_operand.hbm [shape: f32[2,784], index: 1, kind: input, shape index: {}]   ;;  %s1368_s2 = inlined_call_operand.vmem [shape: f32[2], index: 2, kind: input, shape index: {}]   ;;  %s1369_s3 = inlined_call_operand.vmem [shape: f32[2,10], index: 3, kind: input, shape index: {}]   ;;  %s1370_s4 = inlined_call_operand.hbm [shape: f32[2,2], index: 4, kind: output, shape index: {}]  }
   0x1   :  { %10 = vsyncpa [#allocation7], 0 }
   0x2   :  { %11 = vsyncpa [#allocation5], 0 }
   0x3   :  { %12 = vsyncpa [#allocation10], 0 }
   0x4   :  { %13 = vsyncpa [#allocation4], 0  ;;  %s1156_s15 = smov [#allocation2]   ;;  %s1157_s17 = smov [#allocation6]  }
   0x5   :  { %s20_s16 = sshll.u32 %s1156_s15, 4  ;;  %s30_s18 = sshll.u32 %s1157_s17, 4  ;;  %s21_s16 = int_to_ptr.vmem [resolvable:$true] %s20_s16  ;;  %s31_s18 = int_to_ptr.vmem [resolvable:$true] %s30_s18 }
   0x6   :  { %s1070_s19 = scalar_lea.vmem %s21_s16, 224  ;;  %p1075_p1 = scmp.lt.s32.totalorder %s21_s16, %s21_s16 }
   0x7   :  { %p1071_p0 = scmp.ne.s32.totalorder %s21_s16, %s1070_s19  ;;  %p1076_p2 = scmp.lt.s32.totalorder %s1070_s19, %s1070_s19 }
   0x9   :  { %p1077_p3 = por %p1076_p2, %p1075_p1 }
   0xb   :  { %p1078_p4 = pnand %p1077_p3, %p1071_p0 }
   0xd   :  { %1081 = shalt.err (!%p1078_p4)
}
   0xe   :  { %23 = dma.hbm_to_vmem [thread:$0]  %s1366_s0, 224, %s21_s16, [#allocation3]  }
   0xf   :  { %s1090_s22 = scalar_lea.vmem %s31_s18, 224  ;;  %p1095_p6 = scmp.lt.s32.totalorder %s31_s18, %s31_s18 }
  0x10   :  { %p1091_p5 = scmp.ne.s32.totalorder %s31_s18, %s1090_s22  ;;  %p1096_p7 = scmp.lt.s32.totalorder %s1090_s22, %s1090_s22 }
  0x12   :  { %p1097_p8 = por %p1096_p7, %p1095_p6 }
  0x14   :  { %p1098_p9 = pnand %p1097_p8, %p1091_p5 }
  0x16   :  { %1101 = shalt.err (!%p1098_p9)
}
  0x17   :  { %33 = dma.hbm_to_vmem [thread:$0]  %s1367_s1, 224, %s31_s18, [#allocation7]  }
  0x18   :  { %s40_s27 = sshll.u32 %s1368_s2, 4  ;;  %s50_s0 = sshll.u32 %s1369_s3, 4  ;;  %s41_s27 = int_to_ptr.vmem [resolvable:$true] %s40_s27  ;;  %s51_s0 = int_to_ptr.vmem [resolvable:$true] %s50_s0 }
  0x19   :  { %s1102_s30 = scalar_lea.vmem %s41_s27, 16  ;;  %p1107_p11 = scmp.lt.s32.totalorder %s41_s27, %s41_s27 }
  0x1a   :  { %p1103_p10 = scmp.ne.s32.totalorder %s41_s27, %s1102_s30  ;;  %p1108_p12 = scmp.lt.s32.totalorder %s1102_s30, %s1102_s30 }
  0x1c   :  { %p1109_p13 = por %p1108_p12, %p1107_p11 }
  0x1e   :  { %p1110_p0 = pnand %p1109_p13, %p1103_p10 }
  0x20   :  { %1113 = shalt.err (!%p1110_p0)
}
  0x21   :  { %s1158_s5 = smov [#allocation8]   ;;  %s1114_s1 = scalar_lea.vmem %s51_s0, 32 }
  0x22   :  { %43 = dma.vmem_to_smem %s41_s27, 16, %s1158_s5, [#allocation5]  }
  0x23   :  { %p1115_p1 = scmp.ne.s32.totalorder %s51_s0, %s1114_s1  ;;  %p1119_p2 = scmp.lt.s32.totalorder %s51_s0, %s51_s0 }
  0x24   :  { %p1120_p3 = scmp.lt.s32.totalorder %s1114_s1, %s1114_s1 }
  0x26   :  { %p1121_p4 = por %p1120_p3, %p1119_p2 }
  0x28   :  { %p1122_p5 = pnand %p1121_p4, %p1115_p1 }
  0x2a   :  { %1125 = shalt.err (!%p1122_p5)
}
  0x2b   :  { %s1159_s2 = smov [#allocation9]  }
  0x2c   :  { %53 = dma.vmem_to_smem %s51_s0, 32, %s1159_s2, [#allocation10]  }
  0x2d   :  { %1146 = dma.done.wait [#allocation3], 224  }
  0x2e   :  { %1147 = vsyncadd [#allocation3], 4294967072 }
  0x2f   :  { %1148 = dma.done.wait [#allocation7], 224  }
  0x30   :  { %1149 = vsyncadd [#allocation7], 4294967072 }
  0x31   :  { %1150 = dma.done.wait [#allocation5], 16  }
  0x32   :  { %1151 = vsyncadd [#allocation5], 4294967280 }
  0x33   :  { %1152 = dma.done.wait [#allocation10], 32  }
  0x34   :  { %1153 = vsyncadd [#allocation10], 4294967264 }
  0x35   :  { %66 = sfence }
  0x36   :  { %v69_v0 = vld [vmem:[#allocation2] sm:$0xff]  ;;  %v77_v1 = vlaneseq  ;;  %v67_v2 = vld [vmem:[#allocation6] sm:$0xff]  ;;  %v1160_v3 = vmov 1983009808   ;;  %v70_v10 = vld [vmem:[#allocation2 + $0x8] sm:$0x3f] }
  0x37   :  { %v75_v4 = vunpack.c.l.s4 %v1160_v3  ;;  %v114_v7 = vcombine.high %v69_v0, %v69_v0  ;;  %v73_v8 = vcombine.high %v67_v2, %v67_v2  ;;  %v68_v11 = vld [vmem:[#allocation6 + $0x8] sm:$0x3f]  ;;  %v131_v16 = vcombine.high %v70_v10, %v70_v10  ;;  %s438_s3 = sld [smem:[#allocation8]]  ;;  %s1169_s27 = smov [#allocation11]  }
  0x38   :  { %v78_v5 = vshrl.u32 %v77_v1, 7  ;;  %v90_v24 = vcombine.high %v68_v11, %v68_v11  ;;  %vm153_vm0 = vcmask 130048   ;;  %v1161_v27 = vmov 0.0   ;;  %s985_s6 = sld [smem:[#allocation8 + $0x1]]  ;;  %s971_s28 = sshll.u32 %s1169_s27, 4  ;;  %s972_s28 = int_to_ptr.vmem [resolvable:$true] %s971_s28 }
  0x39   :  { %v76_v6 = vunpack.c.0.s8 %v75_v4  ;;  %vm1162_vm1 = vmmov 0   ;;  %s1284_s7 = sld [smem:[#allocation9]]  ;;  %s1126_s29 = scalar_lea.vmem %s972_s28, 32 }
  0x3a   :  { %s1287_s8 = sld [smem:[#allocation9 + $0x80]]  ;;  %p1127_p6 = scmp.ne.s32.totalorder %s972_s28, %s1126_s29 }
  0x3b   :  { %v79_v9 = vsub.s32 %v76_v6, %v78_v5  ;;  %v1164_v6 = vmov 2475754826   ;;  %s1289_s9 = sld [smem:[#allocation9 + $0x1]]  ;;  %p1131_p7 = scmp.lt.s32.totalorder %s972_s28, %s972_s28 }
  0x3c   :  { %s1291_s10 = sld [smem:[#allocation9 + $0x81]]  ;;  %p1132_p8 = scmp.lt.s32.totalorder %s1126_s29, %s1126_s29 }
  0x3d   :  { %v121_v12 = vrot.slane %v69_v0, %v79_v9  ;;  %v128_v13 = vrot.slane %v114_v7, %v79_v9  ;;  %v80_v14 = vrot.slane %v67_v2, %v79_v9  ;;  %v87_v15 = vrot.slane %v73_v8, %v79_v9  ;;  %s1293_s11 = sld [smem:[#allocation9 + $0x2]] }
  0x3e   :  { %v138_v17 = vrot.slane %v70_v10, %v79_v9  ;;  %v97_v18 = vrot.slane %v68_v11, %v79_v9  ;;  %v145_v25 = vrot.slane %v131_v16, %v79_v9  ;;  %v104_v28 = vrot.slane %v90_v24, %v79_v9  ;;  %s1295_s12 = sld [smem:[#allocation9 + $0x82]]  ;;  %p1133_p9 = por %p1132_p8, %p1131_p7 }
  0x3f   :  { %v129_v19 = vcombine.high %v121_v12, %v121_v12  ;;  %v130_v20 = vcombine.high %v128_v13, %v128_v13  ;;  %v88_v21 = vcombine.high %v80_v14, %v80_v14  ;;  %v89_v22 = vcombine.high %v87_v15, %v87_v15  ;;  %s1297_s13 = sld [smem:[#allocation9 + $0x3]] }
  0x40   :  { %v146_v23 = vcombine.high %v138_v17, %v138_v17  ;;  %v105_v26 = vcombine.high %v97_v18, %v97_v18  ;;  %v439_v37 = vstv %s438_s3  ;;  %v442_v38 = vstv %s985_s6  ;;  %s1301_s14 = sld [smem:[#allocation9 + $0x83]]  ;;  %p1134_p10 = pnand %p1133_p9, %p1127_p6 }
  0x41   :  { %188 = vmatprep.subr.mxu0 %v129_v19  ;;  %258 = vmatprep.subr.mxu1 %v130_v20  ;;  %v1163_v2 = vmov 683565275   ;;  %v1165_v8 = vmov 2131351028   ;;  %v1166_v10 = vmov 2102212464  }
  0x42   :  { %189 = vmatpush1.xpose.msra.mxu0 %v121_v12  ;;  %259 = vmatpush1.xpose.msra.mxu1 %v128_v13  ;;  %v1167_v12 = vmov 920167782   ;;  %v1168_v19 = vmov 1326507024   ;;  %s1307_s15 = sld [smem:[#allocation9 + $0x4]] }
  0x43   :  { %222 = vmatprep.mubr.f32.mxu0 %v88_v21  ;;  %292 = vmatprep.mubr.f32.mxu1 %v89_v22  ;;  %s1310_s16 = sld [smem:[#allocation9 + $0x84]] }
  0x44   :  { %328 = vmatprep.subr.mxu0 %v146_v23  ;;  %1023 = vmatprep.subr.mxu1 %v1161_v27  ;;  %s1312_s17 = sld [smem:[#allocation9 + $0x5]] }
  0x45   :  { %223 = vmatmul.mubr.f32.vlgmr.msra.gmra.mxu0 %v80_v14  ;;  %293 = vmatmul.mubr.f32.vlgmr.msra.gmra.mxu1 %v87_v15  ;;  %s1318_s18 = sld [smem:[#allocation9 + $0x85]] }
  0x46   :  { %329 = vmatpush1.xpose.msra.mxu0 %v138_v17  ;;  %1024 = vmatpush3.xpose.msk.msra.mxu1 %vm153_vm0, %v145_v25  ;;  %s1324_s19 = sld [smem:[#allocation9 + $0x6]] }
  0x47   :  { %362 = vmatprep.mubr.f32.mxu0 %v105_v26  ;;  %1025 = vmatprep.mubr.msk.f32.mxu1 %vm1162_vm1, %v1161_v27  ;;  %s1328_s20 = sld [smem:[#allocation9 + $0x86]] }
  0x48   :  { %s1334_s21 = sld [smem:[#allocation9 + $0x7]] }
  0x49   :  { %363 = vmatmul.mubr.f32.vlgmr.msra.gmra.mxu0 %v97_v18  ;;  %1026 = vmatmul.mubr.msk.f32.vlgmr.msra.gmra.mxu1 %vm153_vm0, %v104_v28  ;;  %s1338_s22 = sld [smem:[#allocation9 + $0x87]] }
  0x4a   :  { %s1340_s23 = sld [smem:[#allocation9 + $0x8]] }
  0x4b   :  { %s1345_s24 = sld [smem:[#allocation9 + $0x88]] }
  0x4c   :  { %s1351_s25 = sld [smem:[#allocation9 + $0x89]] }
  0x4d   :  { %s1019_s26 = sld [smem:[#allocation9 + $0x9]] }
 0x105   :  { %v224_v29 = vpop.f32.mrf.mxu0  ;;  %v294_v30 = vpop.f32.mrf.mxu1 }
 0x106   :  { %v295_v33 = vadd.f32 %v294_v30, %v224_v29 }
 0x107   :  { %v226_v31 = vpop.f32.mrf.mxu0  ;;  %v296_v32 = vpop.f32.mrf.mxu1 }
 0x109   :  { %v364_v34 = vpop.f32.mrf.mxu0  ;;  %v434_v35 = vpop.f32.mrf.mxu1 }
 0x10a   :  { %v365_v36 = vadd.f32 %v364_v34, %v295_v33 }
 0x10b   :  { %v366_v39 = vpop.f32.mrf.mxu0  ;;  %v1027_v40 = vpop.f32.mrf.mxu1 }
 0x10c   :  { %v435_v41 = vadd.f32 %v434_v35, %v365_v36 }
 0x10e   :  { %v440_v42 = vadd.f32 %v439_v37, %v435_v41  ;;  %v443_v43 = vadd.f32 %v442_v38, %v435_v41 }
 0x110   :  { %v1207_v44 = vmul.f32 0.5, %v440_v42  ;;  %v1209_v45 = vmul.f32 0.5, %v443_v43 }
 0x112   :  { %v445_v46 = vand.u32 2147483647, %v1207_v44  ;;  %v448_v47 = vand.u32 2139095040, %v1207_v44  ;;  %v656_v48 = vand.u32 2139095040, %v1209_v45  ;;  %v653_v51 = vand.u32 2147483647, %v1209_v45 }
 0x113   :  { %vm447_vm0 = vcmp.lt.s32.totalorder %v1207_v44, 0 }
 0x114   :  { %v449_v49 = vshrl.u32 %v448_v47, 23  ;;  %v452_v50 = vand.u32 8388607, %v445_v46  ;;  %v657_v52 = vshrl.u32 %v656_v48, 23  ;;  %v1219_v57 = vand.u32 8388607, %v653_v51 }
 0x115   :  { %vm1267_vm1 = vcmp.le.f32.partialorder %v445_v46, 0.7853982 }
 0x116   :  { %v986_v53 = vadd.s32 4294967169, %v449_v49  ;;  %v994_v54 = vadd.s32 4294967169, %v657_v52  ;;  %v453_v56 = vor.u32 8388608, %v452_v50  ;;  %v661_v0 = vor.u32 8388608, %v1219_v57 }
 0x118   :  { %v455_v55 = vadd.s32 1, %v986_v53  ;;  %v663_v58 = vadd.s32 1, %v994_v54  ;;  %v1221_v63 = vshll.u32 %v453_v56, 8 }
 0x11a   :  { %vm456_vm2 = vcmp.gt.s32.totalorder %v455_v55, 0  ;;  %vm664_vm3 = vcmp.gt.s32.totalorder %v663_v58, 0 }
 0x11b   :  { %v457_v59 = vsel %vm456_vm2, %v455_v55, 0  ;;  %v665_v62 = vsel %vm664_vm3, %v663_v58, 0  ;;  %v701_v58 = vshll.u32 %v661_v0, 8  ;;  %vm655_vm2 = vcmp.lt.s32.totalorder %v1209_v45, 0 }
 0x11c   :  { %v458_v60 = vshrl.u32 %v457_v59, 5  ;;  %v459_v61 = vand.u32 31, %v457_v59  ;;  %v1224_v4 = vshrl.u32 %v665_v62, 5  ;;  %v667_v5 = vand.u32 31, %v665_v62 }
 0x11d   :  { %vm654_vm3 = vcmp.le.f32.partialorder %v653_v51, 0.7853982 }
 0x11e   :  { %v460_v1 = vsub.s32 32, %v459_v61  ;;  %v462_v3 = vshll.u32 %v1163_v2, %v459_v61  ;;  %v465_v7 = vshll.u32 %v1164_v6, %v459_v61  ;;  %v468_v9 = vshll.u32 %v1165_v8, %v459_v61 }
 0x11f   :  { %v471_v11 = vshll.u32 %v1166_v10, %v459_v61  ;;  %v474_v13 = vshll.u32 %v1167_v12, %v459_v61  ;;  %vm477_vm4 = vcmp.lt.s32.totalorder %v458_v60, 1  ;;  %vm478_vm5 = vcmp.lt.s32.totalorder %v458_v60, 2 }
 0x120   :  { %v463_v14 = vshrl.u32 %v1164_v6, %v460_v1  ;;  %v466_v15 = vshrl.u32 %v1165_v8, %v460_v1  ;;  %v469_v16 = vshrl.u32 %v1166_v10, %v460_v1  ;;  %v461_v17 = vshrl.u32 %v1163_v2, %v460_v1 }
 0x121   :  { %v472_v18 = vshrl.u32 %v1167_v12, %v460_v1  ;;  %v475_v20 = vshrl.u32 %v1168_v19, %v460_v1  ;;  %v668_v24 = vsub.s32 32, %v667_v5  ;;  %vm479_vm6 = vcmp.lt.s32.totalorder %v458_v60, 3 }
 0x122   :  { %v464_v21 = vor.u32 %v463_v14, %v462_v3  ;;  %v467_v22 = vor.u32 %v466_v15, %v465_v7  ;;  %v470_v23 = vor.u32 %v469_v16, %v468_v9  ;;  %vm480_vm7 = vcmp.lt.s32.totalorder %v458_v60, 4 }
 0x123   :  { %v473_v25 = vor.u32 %v472_v18, %v471_v11  ;;  %v476_v26 = vor.u32 %v475_v20, %v474_v13  ;;  %v670_v34 = vshll.u32 %v1163_v2, %v667_v5  ;;  %v671_v37 = vshrl.u32 %v1164_v6, %v668_v24 }
 0x124   :  { %v481_v27 = vsel %vm477_vm4, %v461_v17, %v464_v21  ;;  %v482_v28 = vsel %vm480_vm7, %v470_v23, 2102212464  ;;  %v485_v29 = vsel %vm477_vm4, %v464_v21, %v467_v22  ;;  %v489_v30 = vsel %vm477_vm4, %v467_v22, %v470_v23 }
 0x125   :  { %v483_v31 = vsel %vm479_vm6, %v467_v22, %v482_v28  ;;  %v486_v32 = vsel %vm480_vm7, %v473_v25, 920167782  ;;  %v490_v33 = vsel %vm480_vm7, %v476_v26, 1326507024  ;;  %v673_v38 = vshll.u32 %v1164_v6, %v667_v5 }
 0x126   :  { %v487_v35 = vsel %vm479_vm6, %v470_v23, %v486_v32  ;;  %v491_v36 = vsel %vm479_vm6, %v473_v25, %v490_v33  ;;  %v484_v39 = vsel %vm478_vm5, %v481_v27, %v483_v31  ;;  %v674_v42 = vshrl.u32 %v1165_v8, %v668_v24 }
 0x127   :  { %v488_v40 = vsel %vm478_vm5, %v485_v29, %v487_v35  ;;  %v492_v41 = vsel %vm478_vm5, %v489_v30, %v491_v36  ;;  %v672_v50 = vor.u32 %v671_v37, %v670_v34  ;;  %v676_v53 = vshll.u32 %v1165_v8, %v667_v5 }
 0x128   :  { %v1233_v43 = vmul.u32.u64.low %v1221_v63, %v492_v41  ;;  %v1234_v47 = vmul.u32.u64.high %v1221_v63, %v492_v41, %v1233_v43  ;;  %v1237_v48 = vmul.u32.u64.low %v1221_v63, %v488_v40  ;;  %v1238_v49 = vmul.u32.u64.high %v1221_v63, %v488_v40, %v1237_v48 }
 0x129   :  { %v675_v52 = vor.u32 %v674_v42, %v673_v38  ;;  %v677_v54 = vshrl.u32 %v1166_v10, %v668_v24  ;;  %v679_v55 = vshll.u32 %v1166_v10, %v667_v5  ;;  %v680_v56 = vshrl.u32 %v1167_v12, %v668_v24 }
 0x12a   :  { %v683_v57 = vshrl.u32 %v1168_v19, %v668_v24  ;;  %v500_v59 = vmul.u32 %v1221_v63, %v484_v39  ;;  %v669_v60 = vshrl.u32 %v1163_v2, %v668_v24  ;;  %v682_v62 = vshll.u32 %v1167_v12, %v667_v5 }
 0x12b   :  { %v678_v61 = vor.u32 %v677_v54, %v676_v53  ;;  %vm502_vm8 = vc.u32 %v1234_v47, %v1237_v48  ;;  %v503_v1 = vadd.s32 1, %v1238_v49  ;;  %v681_v3 = vor.u32 %v680_v56, %v679_v55 }
 0x12c   :  { %vm685_vm9 = vcmp.lt.s32.totalorder %v1224_v4, 1  ;;  %v684_v6 = vor.u32 %v683_v57, %v682_v62  ;;  %vm687_vm10 = vcmp.lt.s32.totalorder %v1224_v4, 3  ;;  %vm688_vm11 = vcmp.lt.s32.totalorder %v1224_v4, 4 }
 0x12d   :  { %v693_v7 = vsel %vm685_vm9, %v672_v50, %v675_v52  ;;  %v504_v0 = vsel %vm502_vm8, %v503_v1, %v1238_v49  ;;  %v690_v8 = vsel %vm688_vm11, %v678_v61, 2102212464  ;;  %v694_v63 = vsel %vm688_vm11, %v681_v3, 920167782 }
 0x12e   :  { %v697_v2 = vsel %vm685_vm9, %v675_v52, %v678_v61  ;;  %v505_v9 = vadd.s32 %v504_v0, %v500_v59  ;;  %vm686_vm12 = vcmp.lt.s32.totalorder %v1224_v4, 2  ;;  %v695_v5 = vsel %vm687_vm10, %v678_v61, %v694_v63 }
 0x12f   :  { %v698_v10 = vsel %vm688_vm11, %v684_v6, 1326507024  ;;  %v689_v11 = vsel %vm685_vm9, %v669_v60, %v672_v50  ;;  %v691_v12 = vsel %vm687_vm10, %v675_v52, %v690_v8  ;;  %v696_v13 = vsel %vm686_vm12, %v693_v7, %v695_v5 }
 0x130   :  { %v699_v14 = vsel %vm687_vm10, %v681_v3, %v698_v10  ;;  %v506_v15 = vadd.s32 536870912, %v505_v9  ;;  %v1248_v17 = vmul.u32.u64.low %v701_v58, %v696_v13  ;;  %v1249_v18 = vmul.u32.u64.high %v701_v58, %v696_v13, %v1248_v17 }
 0x131   :  { %v700_v16 = vsel %vm686_vm12, %v697_v2, %v699_v14  ;;  %v692_v22 = vsel %vm686_vm12, %v689_v11, %v691_v12  ;;  %v501_v38 = vadd.s32 %v1237_v48, %v1234_v47  ;;  %vm745_vm6 = vweird.f32 %v1209_v45 }
 0x132   :  { %v1251_v19 = vmul.u32.u64.low %v701_v58, %v700_v16  ;;  %v1252_v20 = vmul.u32.u64.high %v701_v58, %v700_v16, %v1251_v19  ;;  %v1254_v21 = vshrl.u32 %v506_v15, 30  ;;  %v711_v4 = vadd.s32 1, %v1249_v18 }
 0x133   :  { %v708_v24 = vmul.u32 %v701_v58, %v692_v22 }
 0x134   :  { %v508_v23 = vshll.u32 %v1254_v21, 30  ;;  %vm710_vm13 = vc.u32 %v1252_v20, %v1248_v17  ;;  %v709_v59 = vadd.s32 %v1248_v17, %v1252_v20  ;;  %v531_v11 = vsub.s32 4, %v1254_v21 }
 0x135   :  { %v712_v26 = vsel %vm710_vm13, %v711_v4, %v1249_v18 }
 0x136   :  { %v509_v25 = vsub.s32 %v505_v9, %v508_v23  ;;  %v713_v27 = vadd.s32 %v712_v26, %v708_v24  ;;  %v532_v14 = vsel %vm447_vm0, %v531_v11, %v1254_v21 }
 0x137   :  { %v534_v17 = vsel %vm1267_vm1, 0, %v532_v14 }
 0x138   :  { %v511_v28 = vsub.s32 0, %v509_v25  ;;  %v714_v29 = vadd.s32 536870912, %v713_v27  ;;  %v641_v19 = vadd.s32 3, %v534_v17  ;;  %v538_v4 = vand.u32 3, %v534_v17 }
 0x13a   :  { %v987_v30 = vmin.u32 %v511_v28, %v509_v25  ;;  %v715_v31 = vshrl.u32 %v714_v29, 30  ;;  %v642_v51 = vand.u32 3, %v641_v19  ;;  %vm539_vm4 = vcmp.lt.s32.totalorder %v538_v4, 2 }
 0x13b   :  { %vm540_vm5 = vcmp.eq.s32.totalorder %v538_v4, 0  ;;  %vm543_vm7 = vcmp.eq.s32.totalorder %v538_v4, 2  ;;  %v915_v19 = vstv %s1312_s17 }
 0x13c   :  { %v513_v32 = vclz %v987_v30  ;;  %v716_v33 = vshll.u32 %v715_v31, 30  ;;  %v739_v13 = vsub.s32 4, %v715_v31  ;;  %vm643_vm8 = vcmp.lt.s32.totalorder %v642_v51, 2 }
 0x13d   :  { %vm644_vm9 = vcmp.eq.s32.totalorder %v642_v51, 0  ;;  %vm647_vm10 = vcmp.eq.s32.totalorder %v642_v51, 2 }
 0x13e   :  { %v988_v34 = vadd.s32 4294967294, %v513_v32  ;;  %v717_v35 = vsub.s32 %v713_v27, %v716_v33  ;;  %v740_v16 = vsel %vm655_vm2, %v739_v13, %v715_v31  ;;  %v906_v13 = vstv %s1307_s15 }
 0x13f   :  { %v742_v18 = vsel %vm654_vm3, 0, %v740_v16 }
 0x140   :  { %vm989_vm14 = vcmp.lt.s32.totalorder %v988_v34, 0  ;;  %v719_v37 = vsub.s32 0, %v717_v35  ;;  %v849_v20 = vadd.s32 3, %v742_v18 }
 0x141   :  { %v516_v36 = vsel %vm989_vm14, 0, %v988_v34 }
 0x142   :  { %v517_v39 = vsub.s32 32, %v516_v36  ;;  %v521_v40 = vsub.s32 4294967266, %v516_v36  ;;  %v995_v41 = vmin.u32 %v719_v37, %v717_v35  ;;  %v518_v42 = vshll.u32 %v509_v25, %v516_v36 }
 0x143   :  { %v746_v25 = vand.u32 3, %v742_v18  ;;  %v850_v26 = vand.u32 3, %v849_v20  ;;  %v919_v20 = vstv %s1318_s18 }
 0x144   :  { %v519_v43 = vshrl.u32 %v501_v38, %v517_v39  ;;  %v522_v49 = vadd.s32 127, %v521_v40  ;;  %v721_v50 = vclz %v995_v41 }
 0x145   :  { %vm751_vm11 = vcmp.eq.s32.totalorder %v746_v25, 2  ;;  %vm855_vm12 = vcmp.eq.s32.totalorder %v850_v26, 2  ;;  %vm748_vm13 = vcmp.eq.s32.totalorder %v746_v25, 0  ;;  %vm852_vm14 = vcmp.eq.s32.totalorder %v850_v26, 0 }
 0x146   :  { %v520_v52 = vor.u32 %v519_v43, %v518_v42  ;;  %v523_v53 = vshll.u32 %v522_v49, 23  ;;  %v996_v54 = vadd.s32 4294967294, %v721_v50 }
 0x148   :  { %v524_v55 = vor.u32 4788187, %v523_v53  ;;  %vm997_vm15 = vcmp.lt.s32.totalorder %v996_v54, 0  ;;  %v527_v57 = vcvt.s32.f32 %v520_v52 }
 0x149   :  { %v724_v58 = vsel %vm997_vm15, 0, %v996_v54  ;;  %vm747_vm15 = vcmp.lt.s32.totalorder %v746_v25, 2 }
 0x14a   :  { %v525_v56 = vand.u32 2147483647, %v524_v55  ;;  %v725_v60 = vsub.s32 32, %v724_v58  ;;  %v729_v61 = vsub.s32 4294967266, %v724_v58  ;;  %v726_v48 = vshll.u32 %v717_v35, %v724_v58 }
 0x14b   :  { %v872_v58 = vstv %s1284_s7 }
 0x14c   :  { %v528_v47 = vmul.f32 %v527_v57, %v525_v56  ;;  %v727_v62 = vshrl.u32 %v709_v59, %v725_v60  ;;  %v730_v1 = vadd.s32 127, %v729_v61  ;;  %v879_v59 = vstv %s1289_s9 }
 0x14d   :  { %v883_v60 = vstv %s1291_s10 }
 0x14e   :  { %v529_v3 = vxor.u32 2147483648, %v528_v47  ;;  %v728_v6 = vor.u32 %v727_v62, %v726_v48  ;;  %v731_v7 = vshll.u32 %v730_v1, 23  ;;  %v888_v62 = vstv %s1293_s11 }
 0x14f   :  { %v892_v1 = vstv %s1295_s12 }
 0x150   :  { %v530_v0 = vsel %vm447_vm0, %v529_v3, %v528_v47  ;;  %v732_v63 = vor.u32 4788187, %v731_v7  ;;  %v735_v5 = vcvt.s32.f32 %v728_v6  ;;  %vm851_vm0 = vcmp.lt.s32.totalorder %v850_v26, 2 }
 0x151   :  { %v533_v2 = vsel %vm1267_vm1, %v1207_v44, %v530_v0  ;;  %vm537_vm1 = vweird.f32 %v1207_v44  ;;  %v875_v44 = vstv %s1287_s8  ;;  %v928_v26 = vstv %s1328_s20 }
 0x152   :  { %v733_v9 = vand.u32 2147483647, %v732_v63  ;;  %1054 = vcosq.f32 %v533_v2  ;;  %v897_v63 = vstv %s1297_s13 }
 0x153   :  { %1056 = vsinq.f32 %v533_v2  ;;  %v901_v2 = vstv %s1301_s14 }
 0x154   :  { %v736_v10 = vmul.f32 %v735_v5, %v733_v9 }
 0x156   :  { %v737_v12 = vxor.u32 2147483648, %v736_v10 }
 0x158   :  { %v738_v46 = vsel %vm655_vm2, %v737_v12, %v736_v10  ;;  %vm961_vm2 = vcmask 1040384  }
 0x159   :  { %v741_v15 = vsel %vm654_vm3, %v1209_v45, %v738_v46  ;;  %v910_v46 = vstv %s1310_s16  ;;  %vm963_vm3 = vcmask 9216  }
 0x15a   :  { %1058 = vcosq.f32 %v741_v15 }
 0x15b   :  { %1060 = vsinq.f32 %v741_v15 }
 0x15f   :  { %v1055_v22 = vpop.eup %1054 }
 0x160   :  { %v1057_v23 = vpop.eup %1056  ;;  %v544_v24 = vxor.u32 2147483648, %v1055_v22 }
 0x161   :  { %v541_v27 = vxor.u32 2147483648, %v1057_v23 }
 0x162   :  { %v545_v29 = vsel %vm543_vm7, %v544_v24, %v1057_v23  ;;  %v649_v33 = vsel %vm647_vm10, %v544_v24, %v1057_v23  ;;  %v924_v23 = vstv %s1324_s19 }
 0x163   :  { %v542_v31 = vsel %vm540_vm5, %v1055_v22, %v541_v27  ;;  %v646_v32 = vsel %vm644_vm9, %v1055_v22, %v541_v27 }
 0x164   :  { %v546_v39 = vsel %vm539_vm4, %v542_v31, %v545_v29  ;;  %v650_v40 = vsel %vm643_vm8, %v646_v32, %v649_v33  ;;  %v937_v33 = vstv %s1338_s22 }
 0x165   :  { %v547_v53 = vsel %vm537_vm1, nan, %v546_v39  ;;  %v651_v54 = vsel %vm537_vm1, nan, %v650_v40  ;;  %v942_v39 = vstv %s1340_s23  ;;  %v946_v40 = vstv %s1345_s24 }
 0x167   :  { %v1059_v21 = vpop.eup %1058 }
 0x168   :  { %v1061_v28 = vpop.eup %1060  ;;  %v752_v30 = vxor.u32 2147483648, %v1059_v21 }
 0x169   :  { %v749_v34 = vxor.u32 2147483648, %v1061_v28 }
 0x16a   :  { %v753_v35 = vsel %vm751_vm11, %v752_v30, %v1061_v28  ;;  %v857_v36 = vsel %vm855_vm12, %v752_v30, %v1061_v28 }
 0x16b   :  { %v750_v37 = vsel %vm748_vm13, %v1059_v21, %v749_v34  ;;  %v854_v38 = vsel %vm852_vm14, %v1059_v21, %v749_v34  ;;  %v933_v21 = vstv %s1334_s21 }
 0x16c   :  { %v754_v41 = vsel %vm747_vm15, %v750_v37, %v753_v35  ;;  %v858_v42 = vsel %vm851_vm0, %v854_v38, %v857_v36 }
 0x16d   :  { %v755_v43 = vsel %vm745_vm6, nan, %v754_v41  ;;  %v859_v49 = vsel %vm745_vm6, nan, %v858_v42 }
 0x16e   :  { %v861_v50 = vrot.slane %v755_v43, 1  ;;  %v865_v52 = vrot.slane %v859_v49, 1 }
 0x170   :  { %v863_v55 = vmul.f32 %v861_v50, %v547_v53  ;;  %v867_v45 = vmul.f32 %v865_v52, %v547_v53  ;;  %v1314_v56 = vmul.f32 %v861_v50, %v651_v54  ;;  %v1316_v57 = vmul.f32 %v865_v52, %v651_v54 }
 0x171   :  { %v955_v50 = vstv %s1351_s25 }
 0x172   :  { %v870_v61 = vmul.f32 %v863_v55, %v863_v55  ;;  %v877_v47 = vmul.f32 %v867_v45, %v867_v45  ;;  %v886_v48 = vmul.f32 %v1314_v56, %v1314_v56  ;;  %v895_v3 = vmul.f32 %v1316_v57, %v1316_v57 }
 0x173   :  { %v904_v9 = vmul.f32 %v867_v45, %v863_v55  ;;  %v913_v14 = vmul.f32 %v1314_v56, %v863_v55  ;;  %v922_v22 = vmul.f32 %v1316_v57, %v863_v55  ;;  %v931_v27 = vmul.f32 %v1314_v56, %v867_v45 }
 0x174   :  { %v873_v6 = vmul.f32 %v872_v58, %v870_v61  ;;  %v876_v7 = vmul.f32 %v875_v44, %v870_v61  ;;  %v880_v0 = vmul.f32 %v879_v59, %v877_v47  ;;  %v884_v8 = vmul.f32 %v883_v60, %v877_v47 }
 0x175   :  { %v889_v11 = vmul.f32 %v888_v62, %v886_v48  ;;  %v893_v12 = vmul.f32 %v892_v1, %v886_v48  ;;  %v898_v17 = vmul.f32 %v897_v63, %v895_v3  ;;  %v902_v18 = vmul.f32 %v901_v2, %v895_v3 }
 0x176   :  { %v881_v5 = vadd.f32 %v880_v0, %v873_v6  ;;  %v885_v10 = vadd.f32 %v884_v8, %v876_v7  ;;  %v907_v24 = vmul.f32 %v906_v13, %v904_v9  ;;  %v911_v25 = vmul.f32 %v910_v46, %v904_v9 }
 0x177   :  { %v916_v30 = vmul.f32 %v915_v19, %v913_v14  ;;  %v920_v31 = vmul.f32 %v919_v20, %v913_v14  ;;  %v925_v32 = vmul.f32 %v924_v23, %v922_v22  ;;  %v929_v36 = vmul.f32 %v928_v26, %v922_v22 }
 0x178   :  { %v890_v15 = vadd.f32 %v889_v11, %v881_v5  ;;  %v894_v16 = vadd.f32 %v893_v12, %v885_v10  ;;  %v940_v37 = vmul.f32 %v1316_v57, %v867_v45  ;;  %v934_v38 = vmul.f32 %v933_v21, %v931_v27 }
 0x179   :  { %v938_v43 = vmul.f32 %v937_v33, %v931_v27  ;;  %v949_v49 = vmul.f32 %v1316_v57, %v1314_v56  ;;  %v951_v58 = vstv %s1019_s26 }
 0x17a   :  { %v899_v4 = vadd.f32 %v898_v17, %v890_v15  ;;  %v903_v51 = vadd.f32 %v902_v18, %v894_v16  ;;  %v943_v54 = vmul.f32 %v942_v39, %v940_v37  ;;  %v947_v55 = vmul.f32 %v946_v40, %v940_v37 }
 0x17b   :  { %v956_v60 = vmul.f32 %v955_v50, %v949_v49  ;;  %v952_v61 = vmul.f32 %v951_v58, %v949_v49 }
 0x17c   :  { %v908_v28 = vadd.f32 %v907_v24, %v899_v4  ;;  %v912_v29 = vadd.f32 %v911_v25, %v903_v51 }
 0x17e   :  { %v917_v34 = vadd.f32 %v916_v30, %v908_v28  ;;  %v921_v35 = vadd.f32 %v920_v31, %v912_v29 }
 0x180   :  { %v926_v41 = vadd.f32 %v925_v32, %v917_v34  ;;  %v930_v42 = vadd.f32 %v929_v36, %v921_v35 }
 0x182   :  { %v935_v52 = vadd.f32 %v934_v38, %v926_v41  ;;  %v939_v53 = vadd.f32 %v938_v43, %v930_v42 }
 0x184   :  { %v944_v44 = vadd.f32 %v943_v54, %v935_v52  ;;  %v948_v59 = vadd.f32 %v947_v55, %v939_v53 }
 0x186   :  { %v957_v45 = vadd.f32 %v956_v60, %v948_v59  ;;  %v953_v47 = vadd.f32 %v952_v61, %v944_v44 }
 0x188   :  { %v959_v48 = vrot.slane %v957_v45, 7 }
 0x18a   :  { %v962_v62 = vsel %vm961_vm2, %v953_v47, %v959_v48 }
 0x18b   :  { %964 = vst.msk [vmem:[#allocation11] sm:$0x3] %vm963_vm3, %v962_v62 }
 0x18c   :  { %1137 = shalt.err (!%p1134_p10)
}
 0x18d   :  { %974 = dma.vmem_to_hbm [thread:$0]  %s972_s28, 32, %s1370_s4, [#allocation4]  }
 0x18e   :  { %1154 = dma.done.wait [#allocation4], 32  }
 0x18f   :  { %1155 = vsyncadd [#allocation4], 4294967264 }
 0x190   :  { %978 = vsyncpa [#allocation3], 1 }
 0x191   :  { %979 = vsyncpa [#allocation7], 1 }
 0x192   :  { %980 = vsyncpa [#allocation4], 1 }
 0x193   :  { %981 = vsyncpa [#allocation5], 1 }
 0x194   :  { %982 = vsyncpa [#allocation10], 1 }

</bundles_post_ra>
